<compile_context>
chip_gen: v5e
topology: v5e:2x2
jax: 0.10.0
libtpu: 0.0.40
codegen_flags: <defaults>
</compile_context>

<pallas_src>
import jax
import jax.numpy as jnp
from jax.experimental import pallas as pl
from jax.experimental.pallas import tpu as pltpu

SIGMA_DATA = 0.5  # EDMScaling(sigma_data=0.5)


# ----------------------------- Pallas combine kernel --------------------------------

def _combine_kernel(c_out_ref, c_skip_ref, x_ref, net_ref, o_ref):
    """o = net_out * c_out[b] + x * c_skip[b]   (per-batch coefficients read from SMEM)."""
    b = pl.program_id(0)
    c_out = c_out_ref[b]
    c_skip = c_skip_ref[b]
    o_ref[...] = (net_ref[...].astype(jnp.float32) * c_out
                  + x_ref[...].astype(jnp.float32) * c_skip).astype(o_ref.dtype)


def _tpu_budgets():
    """Returns (max_tile_bytes, vmem_limit_bytes, want_two_parallel_blocks)."""
    vmem = None
    try:
        info = pltpu.get_tpu_info()
        vmem = getattr(info, "vmem_capacity_bytes", None)
    except Exception:
        vmem = None
    if vmem is not None and vmem >= 96 * 1024 * 1024:
        # v5e / v6e: 128 MiB physical VMEM, single TensorCore per chip.
        return 8 << 20, 64 << 20, False
    # v7x (64 MiB VMEM, 2 TensorCores) or unknown: conservative tiles.
    return 4 << 20, 40 << 20, True


def _plan_tiles(per_batch_total, itemsize, max_tile_bytes, want_two_blocks, batch):
    """Pick (rows, lanes, tile_rows) for a lane-dense (B, rows, lanes) layout.

    lanes: the largest of {2048,...,128} dividing per_batch_total (lane-dense, unmasked vst).
    tile_rows: multiple of 8 (or full extent), capped so one tile <= max_tile_bytes.
    The row grid uses cdiv, so a partial (masked) last block is fine.
    Returns None when the per-batch size is not a multiple of 128 (caller falls back
    to the fused plain-JAX epilogue).
    """
    lanes = None
    for cand in (2048, 1024, 512, 256, 128):
        if per_batch_total % cand == 0:
            lanes = cand
            break
    if lanes is None:
        return None
    rows = per_batch_total // lanes

    cap_rows = max(8, max_tile_bytes // (lanes * itemsize))
    if rows <= cap_rows:
        tile_rows = rows                      # whole per-batch slab (full extent, always legal)
    else:
        tile_rows = max(8, (cap_rows // 8) * 8)   # multiple of 8; partial last block masked

    # v7x: make sure the ("parallel","parallel") grid has >= 2 iterations so both
    # TensorCores get work; split the row axis even if the tile shrinks slightly.
    if want_two_blocks and batch * pl.cdiv(rows, tile_rows) < 2 and rows > 8:
        half = -(-rows // 2)
        tile_rows = max(8, ((half + 7) // 8) * 8)

    return rows, lanes, tile_rows


def _combine(x3, net3, c_out, c_skip, tile_rows, vmem_limit_bytes):
    """net3 * c_out[b] + x3 * c_skip[b] over (B, rows, lanes); output aliases x3's buffer."""
    B, R, L = x3.shape
    total = B * R * L
    x_item = jnp.dtype(x3.dtype).itemsize
    n_item = jnp.dtype(net3.dtype).itemsize

    tile_spec = pl.BlockSpec((1, tile_rows, L), lambda b, r: (b, r, 0))
    smem_spec = pl.BlockSpec(memory_space=pltpu.MemorySpace.SMEM)

    return pl.pallas_call(
        _combine_kernel,
        out_shape=jax.ShapeDtypeStruct((B, R, L), x3.dtype),
        grid=(B, pl.cdiv(R, tile_rows)),
        in_specs=[smem_spec, smem_spec, tile_spec, tile_spec],
        out_specs=tile_spec,
        # Alias x3 (input idx 2): same dtype/shape as the output by construction, so no
        # outside astype is needed on net_out. NOTE: x's donated buffer is overwritten;
        # fine for this forward pass (x is only read here).
        input_output_aliases={2: 0},
        cost_estimate=pl.CostEstimate(
            flops=3 * total,                                  # 2 muls + 1 add per element
            transcendentals=0,
            bytes_accessed=2 * total * x_item + total * n_item),
        compiler_params=pltpu.CompilerParams(
            dimension_semantics=("parallel", "parallel"),
            vmem_limit_bytes=vmem_limit_bytes),
    )(c_out, c_skip, x3, net3)


# ------------------------------ Denoiser.forward ------------------------------

def denoiser_forward(network_fn, x, sigma, cond, *, combine_impl="auto"):
    """Faithful port of Denoiser.forward with EDM scaling (sigma_data = 0.5).

    combine_impl: "pallas" (force kernel), "fused" (plain JAX, XLA fuses into the
    network epilogue), or "auto" (fused for tiny tensors / non-128-multiple shapes).
    """
    B = x.shape[0]
    per_batch_total = 1
    for d in x.shape[1:]:
        per_batch_total *= d

    sigma32 = sigma.astype(jnp.float32)                      # sigma_shape == (B,)
    denom = sigma32 * sigma32 + SIGMA_DATA * SIGMA_DATA
    c_in = 1.0 / jnp.sqrt(denom)
    c_skip = (SIGMA_DATA * SIGMA_DATA) / denom
    c_out = sigma32 * SIGMA_DATA / jnp.sqrt(denom)
    c_noise = 0.25 * jnp.log(sigma32)                        # matches reference; -inf at sigma==0

    bc = (slice(None),) + (None,) * (x.ndim - 1)

    # input * c_in: plain JAX so XLA fuses it into the network's first op.
    x_in = (x * c_in[bc]).astype(x.dtype)

    # external network call (the wrapped UNet; not part of the Denoiser's own compute)
    net_out = network_fn(x_in, c_noise, cond)

    max_tile_bytes, vmem_limit_bytes, want_two = _tpu_budgets()
    plan = None
    if combine_impl != "fused":
        plan = _plan_tiles(per_batch_total, jnp.dtype(x.dtype).itemsize,
                           max_tile_bytes, want_two, B)

    tensor_bytes = B * per_batch_total * jnp.dtype(x.dtype).itemsize
    small = tensor_bytes < (1 << 20)   # < 1 MiB: kernel launch overhead exceeds the work
    use_pallas = plan is not None and (
        combine_impl == "pallas" or (combine_impl == "auto" and not small))

    if not use_pallas:
        # Fused plain-JAX epilogue: XLA fuses it into the network's last op, eliminating
        # the net_out HBM round trip entirely when the producer is XLA-visible.
        return (net_out * c_out[bc] + x * c_skip[bc]).astype(x.dtype)

    rows, lanes, tile_rows = plan
    x3 = x.reshape(B, rows, lanes)
    net3 = net_out.reshape(B, rows, lanes)        # native dtype; cast happens in-kernel
    out3 = _combine(x3, net3, c_out, c_skip, tile_rows, vmem_limit_bytes)
    return out3.reshape(x.shape)


# --------------------- synthetic `network` and JAX reference ------------------

def make_network(key, C):
    """Deterministic stand-in for the wrapped UNet: 1x1 conv + noise/cond conditioning."""
    # TODO(synk): the real UNet (network_config) is an external module; represented here
    # by a small deterministic JAX function with the same calling convention.
    kw, kb = jax.random.split(key)
    Wmix = jax.random.normal(kw, (C, C), jnp.float32) / jnp.sqrt(C)
    bias = 0.1 * jax.random.normal(kb, (C,), jnp.float32)

    def network_fn(x, c_noise, cond):
        y = jnp.einsum("bchw,oc->bohw", x, Wmix) + bias[None, :, None, None]
        y = y + c_noise[:, None, None, None] + cond["bias"]
        return jnp.tanh(y)

    return network_fn


def denoiser_reference(network_fn, x, sigma, cond):
    s = sigma.astype(jnp.float32)[:, None, None, None]
    c_skip = SIGMA_DATA ** 2 / (s ** 2 + SIGMA_DATA ** 2)
    c_out = s * SIGMA_DATA / jnp.sqrt(s ** 2 + SIGMA_DATA ** 2)
    c_in = 1.0 / jnp.sqrt(s ** 2 + SIGMA_DATA ** 2)
    c_noise = 0.25 * jnp.log(sigma.astype(jnp.float32))
    net_out = network_fn(x * c_in, c_noise, cond)
    return net_out * c_out + x * c_skip


# ------------------------------------ main ------------------------------------

if __name__ == "__main__":
    key = jax.random.PRNGKey(0)
    k_x, k_s, k_net, k_c = jax.random.split(key, 4)

    B, C, H, W = 2, 4, 16, 16
    x = jax.random.normal(k_x, (B, C, H, W), jnp.float32)
    sigma = jnp.exp(jax.random.normal(k_s, (B,), jnp.float32))      # positive sigmas
    cond = {"bias": 0.05 * jax.random.normal(k_c, (1, C, 1, 1), jnp.float32)}

    network_fn = make_network(k_net, C)

    # Force the Pallas combine path so the kernel is exercised at this toy size
    # (the "auto" policy would otherwise pick the fused plain-JAX epilogue).
    fwd = jax.jit(lambda xx, ss, cc: denoiser_forward(
        network_fn, xx, ss, cc, combine_impl="pallas"))
    out = jax.block_until_ready(fwd(x, sigma, cond))

    ref = denoiser_reference(network_fn, x, sigma, cond)
    assert out.shape == (B, C, H, W)
    assert jnp.allclose(out, ref, atol=1e-5, rtol=1e-5), "mismatch vs JAX reference"

    # Also sanity-check the fused (plain JAX) epilogue path.
    fwd_fused = jax.jit(lambda xx, ss, cc: denoiser_forward(
        network_fn, xx, ss, cc, combine_impl="fused"))
    out_fused = jax.block_until_ready(fwd_fused(x, sigma, cond))
    assert jnp.allclose(out_fused, ref, atol=1e-5, rtol=1e-5), "fused path mismatch"

    print("KERNEL_OK")
</pallas_src>

<mosaic_0001>
module attributes {stable_mosaic.version = 11 : i64} {
  func.func @_combine_kernel(%arg0: i32, %arg1: i32, %arg2: memref<2xf32, #tpu.memory_space<smem>>, %arg3: memref<2xf32, #tpu.memory_space<smem>>, %arg4: memref<1x1x1024xf32, #tpu.memory_space<vmem>>, %arg5: memref<1x1x1024xf32, #tpu.memory_space<vmem>>, %arg6: memref<1x1x1024xf32, #tpu.memory_space<vmem>>) attributes {dimension_semantics = [#tpu.dimension_semantics<parallel>, #tpu.dimension_semantics<parallel>], iteration_bounds = array<i64: 2, 1>, scalar_prefetch = 0 : i64, scratch_operands = 0 : i64, tpu.core_type = #tpu.core_type<tc>, window_params = [{transform_indices = @transform_0, window_bounds = array<i64: 2>}, {transform_indices = @transform_1, window_bounds = array<i64: 2>}, {transform_indices = @transform_2, window_bounds = array<i64: 1, 1, 1024>}, {transform_indices = @transform_3, window_bounds = array<i64: 1, 1, 1024>}, {transform_indices = @transform_4, window_bounds = array<i64: 1, 1, 1024>}]} {
    %0 = arith.index_cast %arg0 : i32 to index
    %1 = memref.load %arg2[%0] : memref<2xf32, #tpu.memory_space<smem>>
    %2 = arith.index_cast %arg0 : i32 to index
    %3 = memref.load %arg3[%2] : memref<2xf32, #tpu.memory_space<smem>>
    %c0 = arith.constant 0 : index
    %c0_0 = arith.constant 0 : index
    %c0_1 = arith.constant 0 : index
    %4 = vector.load %arg5[%c0, %c0_0, %c0_1] : memref<1x1x1024xf32, #tpu.memory_space<vmem>>, vector<1x1x1024xf32>
    %5 = vector.broadcast %1 : f32 to vector<1x1x1024xf32>
    %6 = arith.mulf %4, %5 : vector<1x1x1024xf32>
    %c0_2 = arith.constant 0 : index
    %c0_3 = arith.constant 0 : index
    %c0_4 = arith.constant 0 : index
    %7 = vector.load %arg4[%c0_2, %c0_3, %c0_4] : memref<1x1x1024xf32, #tpu.memory_space<vmem>>, vector<1x1x1024xf32>
    %8 = vector.broadcast %3 : f32 to vector<1x1x1024xf32>
    %9 = arith.mulf %7, %8 : vector<1x1x1024xf32>
    %10 = arith.addf %6, %9 : vector<1x1x1024xf32>
    %c0_5 = arith.constant 0 : index
    %c0_6 = arith.constant 0 : index
    %c0_7 = arith.constant 0 : index
    %11 = vector.load %arg6[%c0_5, %c0_6, %c0_7] : memref<1x1x1024xf32, #tpu.memory_space<vmem>>, vector<1x1x1024xf32>
    tpu.vector_store %arg6[%c0_5, %c0_6, %c0_7], %10 {strides = array<i32>} : memref<1x1x1024xf32, #tpu.memory_space<vmem>>, vector<1x1x1024xf32>,
    return
  }
  func.func @transform_0(%arg0: i32, %arg1: i32) -> i32 {
    %c0_i32 = arith.constant 0 : i32
    %c0_i32_0 = arith.constant 0 : i32
    return %c0_i32 : i32
  }
  func.func @transform_1(%arg0: i32, %arg1: i32) -> i32 {
    %c0_i32 = arith.constant 0 : i32
    %c0_i32_0 = arith.constant 0 : i32
    return %c0_i32 : i32
  }
  func.func @transform_2(%arg0: i32, %arg1: i32) -> (i32, i32, i32) {
    %c0_i32 = arith.constant 0 : i32
    %c0_i32_0 = arith.constant 0 : i32
    return %arg0, %arg1, %c0_i32 : i32, i32, i32
  }
  func.func @transform_3(%arg0: i32, %arg1: i32) -> (i32, i32, i32) {
    %c0_i32 = arith.constant 0 : i32
    %c0_i32_0 = arith.constant 0 : i32
    return %arg0, %arg1, %c0_i32 : i32, i32, i32
  }
  func.func @transform_4(%arg0: i32, %arg1: i32) -> (i32, i32, i32) {
    %c0_i32 = arith.constant 0 : i32
    %c0_i32_0 = arith.constant 0 : i32
    return %arg0, %arg1, %c0_i32 : i32, i32, i32
  }
}

</mosaic_0001>

<bundles_post_ra>
// kernel: _lambda_.1
= control target key start
LH: loop header
LB: loop body
LE: loop exit
PB: predicated region body
PF: predicated region fallthrough
CT: control target
= control target key end

     0   :  { %9 = vsyncpa [#allocation3], 0  ;;  %s632_s0 = inlined_call_operand.vmem [shape: f32[2], index: 0, kind: input, shape index: {}]   ;;  %s633_s1 = inlined_call_operand.vmem [shape: f32[2], index: 1, kind: input, shape index: {}]   ;;  %s634_s2 = inlined_call_operand.vmem [shape: f32[2,1,1024], index: 2, kind: input, shape index: {}, may-alias: {2,4}]   ;;  %s635_s3 = inlined_call_operand.vmem [shape: f32[2,1,1024], index: 3, kind: input, shape index: {}]   ;;  %s636_s4 = inlined_call_operand.vmem [shape: f32[2,1,1024], index: 4, kind: output, shape index: {}, may-alias: {2,4}]  }
   0x1   :  { %10 = vsyncpa [#allocation5], 0  ;;  %s569_s15 = smov 0   ;;  %s571_s16 = smov 0  }
   0x2   :  { %s573_s17 = smov 0  }
   0x3 LB: > { %s421_s18 = sadd.s32 4294967295, %s540_s17   ;;  %s28_s19 = sadd.s32 1, %s536_s16  ;;  %s540_s17 = sphi %s573_s17, %s16_s17   ;;  %s536_s16 = sphi %s571_s16, %s639_s16   ;;  %s532_s15 = sphi %s569_s15, %s638_s15  }
   0x4   : > { %p30_p0 = scmp.ge.s32.totalorder %s28_s19, 2  ;;  %p423_p1 = scmp.ge.s32.totalorder %s540_s17, 1 }
   0x5   : > { %p159_p2 = scmp.lt.s32.totalorder %s540_s17, 3  ;;  %p590_p4 = scmp.eq.s32.totalorder %s421_s18, 0 }
   0x6   : > { %s641_s19 = smov (%p30_p0, %s28_s19), 0  ;;  %s171_s23 = sshll.u32 %s632_s0, 4  ;;  %s172_s23 = int_to_ptr.vmem [resolvable:$true] %s171_s23 }
   0x7   : > { %p160_p3 = pnand %p423_p1, %p159_p2  ;;  %s181_s26 = sshll.u32 %s633_s1, 4  ;;  %s182_s26 = int_to_ptr.vmem [resolvable:$true] %s181_s26 }
   0x8   : > { %s542_s27 = smov [#allocation2]   ;;  %s543_s28 = smov [#allocation4]  }
   0x9   : > { %p443_p5 = pneg %p160_p3 }
   0xa   : > { %216 = sbr.rel (%p160_p3) target bundleno = 33 (0x21), region = 36 }
   0xb   : > { %p444_p6 = pnand %p590_p4, %p443_p5 }
   0xd   : > { %446 = dma.vmem_to_smem (!%p444_p6), %s172_s23, 16, %s542_s27, [#allocation3]  }
   0xe   : > { %449 = dma.vmem_to_smem (!%p444_p6), %s182_s26, 16, %s543_s28, [#allocation5]  }
   0xf   : > { %523 = dma.done.wait (%p590_p4), [#allocation3], 16  }
  0x10   : > { %525 = vsyncadd (%p590_p4), [#allocation3], 4294967280 }
  0x11   : > { %527 = dma.done.wait (%p590_p4), [#allocation5], 16  }
  0x12   : > { %529 = vsyncadd (%p590_p4), [#allocation5], 4294967280 }
  0x13   : > { %228 = sfence }
  0x14   : > { %p263_p7 = scmp.lt.s32.totalorder %s532_s15, 1  ;;  %s287_s29 = sld [smem:[#allocation2 + %s532_s15]] }
  0x15   : > { %s288_s30 = sld [smem:[#allocation4 + %s532_s15]] }
  0x16   : > { %s643_s15 = smov (!%p263_p7, %s532_s15), 1 }
  0x17   : > { %s430_s5 = sshll.u32 %s643_s15, 3 }
  0x18   : > { %s270_s8 = scalar_lea.vmem %s634_s2, %s430_s5  ;;  %s278_s11 = scalar_lea.vmem %s635_s3, %s430_s5 }
  0x19   : > { %v289_v0 = vld [vmem:[%s278_s11] sm:$0xff]  ;;  %s286_s14 = scalar_lea.vmem %s636_s4, %s430_s5 }
  0x1a   : > { %v290_v1 = vstv %s287_s29  ;;  %v292_v2 = vld [vmem:[%s270_s8] sm:$0xff] }
  0x1b   : > { %v291_v3 = vmul.f32 %v290_v1, %v289_v0  ;;  %v293_v4 = vstv %s288_s30 }
  0x1c   : > { %v294_v5 = vmul.f32 %v293_v4, %v292_v2 }
  0x1e   : > { %v295_v6 = vadd.f32 %v294_v5, %v291_v3 }
  0x20   : > { %296 = vst [vmem:[%s286_s14] sm:$0xff] %v295_v6 }
  0x21 PF: > { %s16_s17 = sadd.s32 1, %s540_s17   ;;  %s638_s15 = smov %s536_s16 }
  0x22   : > { %p13_p8 = scmp.ge.s32.totalorder %s16_s17, 4   ;;  %s639_s16 = smov %s641_s19 }
  0x24   :  { %15 = sbr.rel (!%p13_p8) target bundleno = 3 (0x3), region = 78 }
  0x29   :  { %324 = vsyncpa [#allocation3], 1 }
  0x2a   :  { %326 = vsyncpa [#allocation3 + $0x1], 1 }
  0x2b   :  { %327 = vsyncpa [#allocation5], 1 }

</bundles_post_ra>
